<compile_context>
chip_gen: v7x
topology: tpu7x:2x2x1
jax: 0.10.0
libtpu: 0.0.40
codegen_flags: <defaults>
</compile_context>

<pallas_src>
import functools

import jax
import jax.numpy as jnp
from jax.experimental import pallas as pl
from jax.experimental.pallas import tpu as pltpu

EPS = 1e-5


def _ibn_kernel(x_ref, gamma_ref, beta_ref, o_ref, *, half, tc):
    # x_ref: (N, TC, HW) block of channels [c0, c0+TC)
    c0 = pl.program_id(0) * tc
    x = x_ref[...].astype(jnp.float32)                       # (N, TC, HW)
    n = x.shape[0]
    hw = x.shape[-1]
    inv_hw = 1.0 / hw
    inv_nhw = 1.0 / (n * hw)

    # Single reduction pass: sum and sum-of-squares over the lane (H*W) axis.
    s = jnp.sum(x, axis=-1, keepdims=True)                   # (N, TC, 1)
    ss = jnp.sum(x * x, axis=-1, keepdims=True)              # (N, TC, 1)

    # InstanceNorm stats: per (n, c).
    mean_in = s * inv_hw
    var_in = ss * inv_hw - mean_in * mean_in

    # BatchNorm stats: per c over (n, H*W) — derived from the same partials.
    s_c = jnp.sum(s, axis=0, keepdims=True)                  # (1, TC, 1)
    ss_c = jnp.sum(ss, axis=0, keepdims=True)                # (1, TC, 1)
    mean_bn = s_c * inv_nhw
    var_bn = ss_c * inv_nhw - mean_bn * mean_bn

    # Per-channel select: channels < half -> IN stats, else BN stats.
    ch = c0 + jax.lax.broadcasted_iota(jnp.int32, (1, tc, 1), 1)
    use_in = ch < half
    mean = jnp.where(use_in, mean_in, mean_bn)                # (N, TC, 1)
    var = jnp.where(use_in, var_in, var_bn)                   # (N, TC, 1)
    inv = jax.lax.rsqrt(jnp.maximum(var, 0.0) + EPS)

    g = gamma_ref[...].astype(jnp.float32)[None]              # (1, TC, 1)
    b = beta_ref[...].astype(jnp.float32)[None]               # (1, TC, 1)

    # y = (x - mean) * inv * g + b, folded into a single fused multiply-add.
    scale = inv * g                                           # (N, TC, 1)
    shift = b - mean * scale                                  # (N, TC, 1)
    o_ref[...] = (x * scale + shift).astype(o_ref.dtype)


def _pick_tc(N, C, HW, itemsize):
    # Target ~4 MiB per input tile (x2 arrays x2 pipeline buffers ~= 16 MiB VMEM),
    # safely within the default scoped VMEM on v5e/v6e/v7x while being large
    # enough to sit near the HBM roofline.
    budget = 4 * 1024 * 1024
    per_c = N * HW * itemsize
    if C % 8 != 0 or C * per_c <= budget:
        # Block second-last dim must be a multiple of 8 or equal the full C.
        return C
    tc = max(8, (budget // per_c) // 8 * 8)
    return int(min(tc, C))


def ibn_forward(x, in_gamma, in_beta, bn_gamma, bn_beta, half):
    N, C, H, W = x.shape
    HW = H * W
    x3 = x.reshape(N, C, HW)                    # free: H, W are innermost/contiguous
    gamma = jnp.concatenate([in_gamma, bn_gamma]).reshape(C, 1)
    beta = jnp.concatenate([in_beta, bn_beta]).reshape(C, 1)

    tc = _pick_tc(N, C, HW, jnp.dtype(x.dtype).itemsize)
    grid = (pl.cdiv(C, tc),)
    kernel = functools.partial(_ibn_kernel, half=half, tc=tc)

    # TODO(synk): for very large N*H*W (e.g. N=256, 112x112) the whole-N BN block
    # exceeds VMEM; that case needs an N/HW reduction grid axis with sum/sumsq
    # scratch accumulators and a finalize pass (esp. for v7x's 64 MiB VMEM).
    out = pl.pallas_call(
        kernel,
        out_shape=jax.ShapeDtypeStruct((N, C, HW), x.dtype),
        grid=grid,
        in_specs=[
            pl.BlockSpec((N, tc, HW), lambda c: (0, c, 0)),
            pl.BlockSpec((tc, 1), lambda c: (c, 0)),
            pl.BlockSpec((tc, 1), lambda c: (c, 0)),
        ],
        out_specs=pl.BlockSpec((N, tc, HW), lambda c: (0, c, 0)),
        compiler_params=pltpu.CompilerParams(
            dimension_semantics=("parallel",),
            vmem_limit_bytes=32 * 1024 * 1024,
        ),
    )(x3, gamma, beta)
    return out.reshape(N, C, H, W)


def _reference(x, in_gamma, in_beta, bn_gamma, bn_beta, half):
    x = x.astype(jnp.float32)
    x1, x2 = x[:, :half], x[:, half:]
    # instance norm: per (n, c) over H, W
    m1 = jnp.mean(x1, axis=(2, 3), keepdims=True)
    v1 = jnp.mean((x1 - m1) ** 2, axis=(2, 3), keepdims=True)
    o1 = (x1 - m1) / jnp.sqrt(v1 + EPS) * in_gamma[None, :, None, None] \
        + in_beta[None, :, None, None]
    # batch norm (training): per c over N, H, W
    m2 = jnp.mean(x2, axis=(0, 2, 3), keepdims=True)
    v2 = jnp.mean((x2 - m2) ** 2, axis=(0, 2, 3), keepdims=True)
    o2 = (x2 - m2) / jnp.sqrt(v2 + EPS) * bn_gamma[None, :, None, None] \
        + bn_beta[None, :, None, None]
    return jnp.concatenate([o1, o2], axis=1)


if __name__ == "__main__":
    key = jax.random.PRNGKey(0)
    N, C, H, W = 2, 4, 16, 16
    planes = C
    half1 = planes // 2          # InstanceNorm channels
    half2 = planes - half1       # BatchNorm channels

    k_x, k_g1, k_b1, k_g2, k_b2 = jax.random.split(key, 5)
    x = jax.random.normal(k_x, (N, C, H, W), dtype=jnp.float32)

    # Random affine params to exercise the gamma/beta path (PyTorch default is 1/0).
    in_gamma = jax.random.normal(k_g1, (half1,), dtype=jnp.float32) * 0.1 + 1.0
    in_beta = jax.random.normal(k_b1, (half1,), dtype=jnp.float32) * 0.1
    bn_gamma = jax.random.normal(k_g2, (half2,), dtype=jnp.float32) * 0.1 + 1.0
    bn_beta = jax.random.normal(k_b2, (half2,), dtype=jnp.float32) * 0.1

    out = ibn_forward(x, in_gamma, in_beta, bn_gamma, bn_beta, half1)
    out = jax.block_until_ready(out)

    ref = _reference(x, in_gamma, in_beta, bn_gamma, bn_beta, half1)
    assert out.shape == (N, C, H, W)
    assert jnp.allclose(out, ref, atol=1e-4, rtol=1e-4)

    print("KERNEL_OK")
</pallas_src>

<mosaic_0001>
module attributes {stable_mosaic.version = 11 : i64} {
  func.func @_ibn_kernel(%arg0: i32, %arg1: memref<2x4x256xf32, #tpu.memory_space<vmem>>, %arg2: memref<4x1xf32, #tpu.memory_space<vmem>>, %arg3: memref<4x1xf32, #tpu.memory_space<vmem>>, %arg4: memref<2x4x256xf32, #tpu.memory_space<vmem>>) attributes {dimension_semantics = [#tpu.dimension_semantics<parallel>], iteration_bounds = array<i64: 1>, scalar_prefetch = 0 : i64, scratch_operands = 0 : i64, tpu.core_type = #tpu.core_type<tc>, window_params = [{transform_indices = @transform_0, window_bounds = array<i64: 2, 4, 256>}, {transform_indices = @transform_1, window_bounds = array<i64: 4, 1>}, {transform_indices = @transform_2, window_bounds = array<i64: 4, 1>}, {transform_indices = @transform_3, window_bounds = array<i64: 2, 4, 256>}]} {
    %c4_i32 = arith.constant 4 : i32
    %0 = arith.muli %arg0, %c4_i32 : i32
    %c0 = arith.constant 0 : index
    %c0_0 = arith.constant 0 : index
    %c0_1 = arith.constant 0 : index
    %1 = vector.load %arg1[%c0, %c0_0, %c0_1] : memref<2x4x256xf32, #tpu.memory_space<vmem>>, vector<2x4x256xf32>
    %cst = arith.constant dense<0.000000e+00> : vector<2x4xf32>
    %2 = vector.multi_reduction <add>, %1, %cst [2] : vector<2x4x256xf32> to vector<2x4xf32>
    %3 = vector.shape_cast %2 : vector<2x4xf32> to vector<2x4x1xf32>
    %4 = arith.mulf %1, %1 : vector<2x4x256xf32>
    %cst_2 = arith.constant dense<0.000000e+00> : vector<2x4xf32>
    %5 = vector.multi_reduction <add>, %4, %cst_2 [2] : vector<2x4x256xf32> to vector<2x4xf32>
    %6 = vector.shape_cast %5 : vector<2x4xf32> to vector<2x4x1xf32>
    %cst_3 = arith.constant 3.906250e-03 : f32
    %7 = vector.broadcast %cst_3 : f32 to vector<2x4x1xf32>
    %8 = arith.mulf %3, %7 : vector<2x4x1xf32>
    %cst_4 = arith.constant 3.906250e-03 : f32
    %9 = vector.broadcast %cst_4 : f32 to vector<2x4x1xf32>
    %10 = arith.mulf %6, %9 : vector<2x4x1xf32>
    %11 = arith.mulf %8, %8 : vector<2x4x1xf32>
    %12 = arith.subf %10, %11 : vector<2x4x1xf32>
    %cst_5 = arith.constant dense<0.000000e+00> : vector<4x1xf32>
    %13 = vector.multi_reduction <add>, %3, %cst_5 [0] : vector<2x4x1xf32> to vector<4x1xf32>
    %14 = vector.shape_cast %13 : vector<4x1xf32> to vector<1x4x1xf32>
    %cst_6 = arith.constant dense<0.000000e+00> : vector<4x1xf32>
    %15 = vector.multi_reduction <add>, %6, %cst_6 [0] : vector<2x4x1xf32> to vector<4x1xf32>
    %16 = vector.shape_cast %15 : vector<4x1xf32> to vector<1x4x1xf32>
    %cst_7 = arith.constant 0.001953125 : f32
    %17 = vector.broadcast %cst_7 : f32 to vector<1x4x1xf32>
    %18 = arith.mulf %14, %17 : vector<1x4x1xf32>
    %cst_8 = arith.constant 0.001953125 : f32
    %19 = vector.broadcast %cst_8 : f32 to vector<1x4x1xf32>
    %20 = arith.mulf %16, %19 : vector<1x4x1xf32>
    %21 = arith.mulf %18, %18 : vector<1x4x1xf32>
    %22 = arith.subf %20, %21 : vector<1x4x1xf32>
    %23 = tpu.iota {dimensions = array<i32: 1>} : vector<1x4x1xi32>
    %24 = vector.broadcast %0 : i32 to vector<1x4x1xi32>
    %25 = arith.addi %24, %23 : vector<1x4x1xi32>
    %c2_i32 = arith.constant 2 : i32
    %26 = vector.broadcast %c2_i32 : i32 to vector<1x4x1xi32>
    %27 = arith.cmpi slt, %25, %26 : vector<1x4x1xi32>
    %28 = vector.shape_cast %27 : vector<1x4x1xi1> to vector<1x4x1xi1>
    %29 = vector.broadcast %28 : vector<1x4x1xi1> to vector<2x4x1xi1>
    %30 = vector.shape_cast %18 : vector<1x4x1xf32> to vector<1x4x1xf32>
    %31 = vector.broadcast %30 : vector<1x4x1xf32> to vector<2x4x1xf32>
    %32 = arith.select %29, %8, %31 : vector<2x4x1xi1>, vector<2x4x1xf32>
    %33 = vector.shape_cast %27 : vector<1x4x1xi1> to vector<1x4x1xi1>
    %34 = vector.broadcast %33 : vector<1x4x1xi1> to vector<2x4x1xi1>
    %35 = vector.shape_cast %22 : vector<1x4x1xf32> to vector<1x4x1xf32>
    %36 = vector.broadcast %35 : vector<1x4x1xf32> to vector<2x4x1xf32>
    %37 = arith.select %34, %12, %36 : vector<2x4x1xi1>, vector<2x4x1xf32>
    %cst_9 = arith.constant 0.000000e+00 : f32
    %38 = vector.broadcast %cst_9 : f32 to vector<2x4x1xf32>
    %39 = arith.maximumf %37, %38 : vector<2x4x1xf32>
    %cst_10 = arith.constant 9.99999974E-6 : f32
    %40 = vector.broadcast %cst_10 : f32 to vector<2x4x1xf32>
    %41 = arith.addf %39, %40 : vector<2x4x1xf32>
    %42 = math.rsqrt %41 : vector<2x4x1xf32>
    %c0_11 = arith.constant 0 : index
    %c0_12 = arith.constant 0 : index
    %43 = vector.load %arg2[%c0_11, %c0_12] : memref<4x1xf32, #tpu.memory_space<vmem>>, vector<4x1xf32>
    %44 = vector.shape_cast %43 : vector<4x1xf32> to vector<1x4x1xf32>
    %c0_13 = arith.constant 0 : index
    %c0_14 = arith.constant 0 : index
    %45 = vector.load %arg3[%c0_13, %c0_14] : memref<4x1xf32, #tpu.memory_space<vmem>>, vector<4x1xf32>
    %46 = vector.shape_cast %45 : vector<4x1xf32> to vector<1x4x1xf32>
    %47 = vector.broadcast %44 : vector<1x4x1xf32> to vector<2x4x1xf32>
    %48 = arith.mulf %42, %47 : vector<2x4x1xf32>
    %49 = arith.mulf %32, %48 : vector<2x4x1xf32>
    %50 = vector.broadcast %46 : vector<1x4x1xf32> to vector<2x4x1xf32>
    %51 = arith.subf %50, %49 : vector<2x4x1xf32>
    %52 = vector.broadcast %48 : vector<2x4x1xf32> to vector<2x4x256xf32>
    %53 = arith.mulf %1, %52 : vector<2x4x256xf32>
    %54 = vector.broadcast %51 : vector<2x4x1xf32> to vector<2x4x256xf32>
    %55 = arith.addf %53, %54 : vector<2x4x256xf32>
    %c0_15 = arith.constant 0 : index
    %c0_16 = arith.constant 0 : index
    %c0_17 = arith.constant 0 : index
    %56 = vector.load %arg4[%c0_15, %c0_16, %c0_17] : memref<2x4x256xf32, #tpu.memory_space<vmem>>, vector<2x4x256xf32>
    tpu.vector_store %arg4[%c0_15, %c0_16, %c0_17], %55 {strides = array<i32>} : memref<2x4x256xf32, #tpu.memory_space<vmem>>, vector<2x4x256xf32>,
    return
  }
  func.func @transform_0(%arg0: i32) -> (i32, i32, i32) {
    %c0_i32 = arith.constant 0 : i32
    %c0_i32_0 = arith.constant 0 : i32
    %c0_i32_1 = arith.constant 0 : i32
    return %c0_i32, %arg0, %c0_i32_0 : i32, i32, i32
  }
  func.func @transform_1(%arg0: i32) -> (i32, i32) {
    %c0_i32 = arith.constant 0 : i32
    %c0_i32_0 = arith.constant 0 : i32
    return %arg0, %c0_i32 : i32, i32
  }
  func.func @transform_2(%arg0: i32) -> (i32, i32) {
    %c0_i32 = arith.constant 0 : i32
    %c0_i32_0 = arith.constant 0 : i32
    return %arg0, %c0_i32 : i32, i32
  }
  func.func @transform_3(%arg0: i32) -> (i32, i32, i32) {
    %c0_i32 = arith.constant 0 : i32
    %c0_i32_0 = arith.constant 0 : i32
    %c0_i32_1 = arith.constant 0 : i32
    return %c0_i32, %arg0, %c0_i32_0 : i32, i32, i32
  }
}

</mosaic_0001>

<bundles_post_ra>
// kernel: tpu_custom_call.1
= control target key start
LH: loop header
LB: loop body
LE: loop exit
PB: predicated region body
PF: predicated region fallthrough
CT: control target
= control target key end

     0   :  { %8 = vsyncpa [#allocation3], 0  ;;  %s337_s0 = inlined_call_operand.hbm [shape: f32[2,4,256], index: 0, kind: input, shape index: {}]   ;;  %s338_s1 = inlined_call_operand.vmem [shape: f32[4,1], index: 1, kind: input, shape index: {}]   ;;  %s339_s2 = inlined_call_operand.vmem [shape: f32[4,1], index: 2, kind: input, shape index: {}]   ;;  %s340_s3 = inlined_call_operand.hbm [shape: f32[2,4,256], index: 3, kind: output, shape index: {}]  }
   0x1   :  { %9 = vsyncpa [#allocation4], 0  ;;  %s243_s12 = smov [#allocation2]   ;;  %s195_s16 = scalar_lea.hbm %s337_s0, 256 }
   0x2   :  { %s15_s13 = sshll.u32 %s243_s12, 4  ;;  %p196_p0 = scmp.ne.s32.totalorder %s337_s0, %s195_s16  ;;  %s16_s13 = int_to_ptr.vmem [resolvable:$true] %s15_s13 }
   0x3   :  { %p199_p1 = scmp.lt.u32.totalorder %s195_s16, %s337_s0 }
   0x5   :  { %p201_p2 = pnand %p199_p1, %p196_p0 }
   0x7   :  { %204 = shalt.err (!%p201_p2)
}
   0x8   :  { %s205_s21 = scalar_lea.vmem %s16_s13, 256  ;;  %p210_p4 = scmp.lt.s32.totalorder %s16_s13, %s16_s13 }
   0x9   :  { %p206_p3 = scmp.ne.s32.totalorder %s16_s13, %s205_s21  ;;  %p211_p5 = scmp.lt.s32.totalorder %s205_s21, %s205_s21 }
   0xb   :  { %p212_p6 = por %p211_p5, %p210_p4 }
   0xd   :  { %p213_p7 = pnand %p212_p6, %p206_p3 }
   0xf   :  { %216 = shalt.err (!%p213_p7)
}
  0x10   :  { %s244_s22 = smov 128   ;;  %s245_s23 = smov 8  }
  0x11   :  { %21 = dma.hbm_to_vmem [thread:$0]  %s337_s0, 256, %s16_s13, [#allocation3], %s244_s22, %s244_s22, %s245_s23  }
  0x12   :  { %239 = dma.done.wait [#allocation3], 256  }
  0x13   :  { %240 = vsyncadd [#allocation3], 4294967040  ;;  %vm38_vm0 = vcmask 1043456   ;;  %v284_v0 = vld [vmem:[#allocation2] sm:$0xff]  ;;  %v286_v1 = vld [vmem:[#allocation2 + $0x8] sm:$0xff]  ;;  %v246_v20 = vmov 0   ;;  %v85_v26 = vlaneseq }
  0x14   :  { %v34_v2 = vcombine.high %v284_v0, %v284_v0  ;;  %v39_v3 = vsel %vm38_vm0, %v284_v0, 0.0  ;;  %v49_v4 = vmul.f32 %v284_v0, %v284_v0  ;;  %v35_v5 = vcombine.high %v286_v1, %v286_v1  ;;  %188 = vset.pattern.permute.xlu1 %v246_v20  ;;  %187 = vset.pattern.permute.xlu0 %v246_v20  ;;  %v102_v51 = vld [vmem:[%s338_s1] sm:$0xf]  ;;  %s248_s1 = smov [#allocation5]  }
  0x15   :  { %v44_v6 = vsel %vm38_vm0, %v286_v1, 0.0  ;;  %v50_v7 = vmul.f32 %v286_v1, %v286_v1  ;;  %v86_v39 = vshrl.u32 %v85_v26, 7  ;;  %v103_v57 = vld [vmem:[%s339_s2] sm:$0xf]  ;;  %v247_v63 = vmov 839922192  }
  0x16   :  { %v40_v8 = vsel %vm38_vm0, %v34_v2, 0.0  ;;  %v53_v9 = vcombine.high %v49_v4, %v49_v4  ;;  %v57_v10 = vsel %vm38_vm0, %v49_v4, 0.0  ;;  %v45_v11 = vsel %vm38_vm0, %v35_v5, 0.0  ;;  %s169_s2 = sshll.u32 %s248_s1, 4  ;;  %s170_s2 = int_to_ptr.vmem [resolvable:$true] %s169_s2 }
  0x17   :  { %v41_v12 = vadd.f32 %v40_v8, %v39_v3  ;;  %v54_v13 = vcombine.high %v50_v7, %v50_v7  ;;  %v62_v15 = vsel %vm38_vm0, %v50_v7, 0.0  ;;  %v46_v17 = vadd.f32 %v45_v11, %v44_v6  ;;  %s217_s29 = scalar_lea.vmem %s170_s2, 256  ;;  %p222_p9 = scmp.lt.s32.totalorder %s170_s2, %s170_s2 }
  0x18   :  { %v58_v14 = vsel %vm38_vm0, %v53_v9, 0.0  ;;  %vm89_vm1 = vcmp.lt.s32.totalorder %v86_v39, 2  ;;  %v119_v2 = vunpack.c.l.s4 %v247_v63  ;;  %p218_p8 = scmp.ne.s32.totalorder %s170_s2, %s217_s29  ;;  %p223_p10 = scmp.lt.s32.totalorder %s217_s29, %s217_s29 }
  0x19   :  { %42 = vadd.xlane.f32.xlu0 %v41_v12  ;;  %v59_v16 = vadd.f32 %v58_v14, %v57_v10  ;;  %v63_v18 = vsel %vm38_vm0, %v54_v13, 0.0 }
  0x1a   :  { %v64_v19 = vadd.f32 %v63_v18, %v62_v15  ;;  %v120_v3 = vunpack.c.0.s8 %v119_v2  ;;  %p224_p11 = por %p223_p10, %p222_p9 }
  0x1b   :  { %60 = vadd.xlane.f32.xlu1 %v59_v16 }
  0x1c   :  { %v123_v4 = vsub.s32 %v120_v3, %v86_v39  ;;  %p225_p12 = pnand %p224_p11, %p218_p8 }
  0x1d   :  { %47 = vadd.xlane.f32.xlu0 %v46_v17 }
  0x1f   :  { %65 = vadd.xlane.f32.xlu1 %v64_v19 }
  0xa6   :  { %v43_v21 = vpop.xlane.xlu0 %42 }
  0xa7   :  { %v67_v23 = vmul.f32 0.00390625, %v43_v21  ;;  %v75_v25 = vsel %vm38_vm0, %v43_v21, 0.0 }
  0xa8   :  { %v61_v22 = vpop.xlane.xlu1 %60 }
  0xa9   :  { %v71_v31 = vmul.f32 %v67_v23, %v67_v23  ;;  %v69_v32 = vmul.f32 0.00390625, %v61_v22  ;;  %v78_v33 = vsel %vm38_vm0, %v61_v22, 0.0 }
  0xaa   :  { %v48_v24 = vpop.xlane.xlu0 %47 }
  0xab   :  { %v68_v27 = vmul.f32 0.00390625, %v48_v24  ;;  %v76_v28 = vsel %vm38_vm0, %v48_v24, 0.0  ;;  %v73_v42 = vsub.f32 %v69_v32, %v71_v31 }
  0xac   :  { %v77_v29 = vadd.f32 %v76_v28, %v75_v25  ;;  %v66_v30 = vpop.xlane.xlu1 %65 }
  0xad   :  { %v79_v34 = vsel %vm38_vm0, %v66_v30, 0.0  ;;  %v72_v35 = vmul.f32 %v68_v27, %v68_v27  ;;  %v70_v37 = vmul.f32 0.00390625, %v66_v30 }
  0xae   :  { %v81_v36 = vmul.f32 0.001953125, %v77_v29  ;;  %v80_v38 = vadd.f32 %v79_v34, %v78_v33 }
  0xaf   :  { %v74_v43 = vsub.f32 %v70_v37, %v72_v35 }
  0xb0   :  { %v82_v40 = vmul.f32 0.001953125, %v80_v38  ;;  %v83_v41 = vmul.f32 %v81_v36, %v81_v36  ;;  %v92_v56 = vsel %vm89_vm1, %v67_v23, %v81_v36  ;;  %v93_v59 = vsel %vm89_vm1, %v68_v27, %v81_v36 }
  0xb2   :  { %v84_v44 = vsub.f32 %v82_v40, %v83_v41 }
  0xb4   :  { %v94_v45 = vsel %vm89_vm1, %v73_v42, %v84_v44  ;;  %v95_v46 = vsel %vm89_vm1, %v74_v43, %v84_v44 }
  0xb5   :  { %v96_v47 = vmax.f32 %v94_v45, 0.0  ;;  %v97_v48 = vmax.f32 %v95_v46, 0.0 }
  0xb7   :  { %v98_v49 = vadd.f32 1e-05, %v96_v47  ;;  %v99_v50 = vadd.f32 1e-05, %v97_v48 }
  0xb9   :  { %191 = vrsqrt.f32 %v98_v49 }
  0xba   :  { %193 = vrsqrt.f32 %v99_v50 }
  0xc3   :  { %v192_v52 = vpop.eup %191 }
  0xc4   :  { %v194_v53 = vpop.eup %193  ;;  %v104_v54 = vmul.f32 %v192_v52, %v102_v51 }
  0xc5   :  { %v105_v55 = vmul.f32 %v194_v53, %v102_v51 }
  0xc6   :  { %112 = vperm.xlu0 %187, %v104_v54   ;;  %v106_v58 = vmul.f32 %v104_v54, %v92_v56 }
  0xc7   :  { %116 = vperm.xlu1 %188, %v105_v55   ;;  %v107_v61 = vmul.f32 %v105_v55, %v93_v59 }
  0xc8   :  { %v108_v60 = vsub.f32 %v103_v57, %v106_v58 }
  0xc9   :  { %v109_v62 = vsub.f32 %v103_v57, %v107_v61 }
  0xcb   :  { %138 = vperm.xlu1 %188, %v108_v60  }
  0xcf   :  { %142 = vperm.xlu1 %188, %v109_v62  }
 0x145   :  { %v113_v5 = vpop.permute.xlu0 %112 }
 0x146   :  { %v117_v6 = vpop.permute.xlu1 %116  ;;  %v124_v7 = vrot.slane %v113_v5, %v123_v4 }
 0x147   :  { %v131_v9 = vrot.slane %v117_v6, %v123_v4 }
 0x148   :  { %v134_v10 = vmul.f32 %v124_v7, %v284_v0 }
 0x149   :  { %v135_v14 = vmul.f32 %v131_v9, %v286_v1 }
 0x14a   :  { %v139_v8 = vpop.permute.xlu1 %138 }
 0x14b   :  { %v150_v11 = vrot.slane %v139_v8, %v123_v4 }
 0x14d   :  { %v160_v12 = vadd.f32 %v150_v11, %v134_v10 }
 0x14e   :  { %v143_v13 = vpop.permute.xlu1 %142 }
 0x14f   :  { %162 = vst [vmem:[#allocation5] sm:$0xff] %v160_v12  ;;  %v157_v15 = vrot.slane %v143_v13, %v123_v4 }
 0x151   :  { %v161_v16 = vadd.f32 %v157_v15, %v135_v14 }
 0x153   :  { %163 = vst [vmem:[#allocation5 + $0x8] sm:$0xff] %v161_v16 }
 0x154   :  { %228 = shalt.err (!%p225_p12)
}
 0x155   :  { %s229_s5 = scalar_lea.hbm %s340_s3, 256 }
 0x156   :  { %p230_p13 = scmp.ne.s32.totalorder %s340_s3, %s229_s5  ;;  %p233_p0 = scmp.lt.u32.totalorder %s229_s5, %s340_s3 }
 0x158   :  { %p235_p1 = pnand %p233_p0, %p230_p13 }
 0x15a   :  { %238 = shalt.err (!%p235_p1)
}
 0x15b   :  { %175 = dma.vmem_to_hbm [thread:$0]  %s170_s2, 256, %s340_s3, [#allocation4], %s244_s22, %s244_s22, %s245_s23  }
 0x15c   :  { %241 = dma.done.wait [#allocation4], 256  }
 0x15d   :  { %242 = vsyncadd [#allocation4], 4294967040 }
 0x15e   :  { %179 = vsyncpa [#allocation3], 1 }
 0x15f   :  { %180 = vsyncpa [#allocation4], 1 }

</bundles_post_ra>
